<compile_context>
chip_gen: v7x
topology: tpu7x:2x2x1
jax: 0.10.0
libtpu: 0.0.40
codegen_flags: <defaults>
</compile_context>

<pallas_src>
import functools

import jax
import jax.numpy as jnp
from jax import lax
from jax.experimental import pallas as pl
from jax.experimental.pallas import tpu as pltpu


def _round_up(a, b):
    return ((a + b - 1) // b) * b


# ----------------------------------------------------------------------------
# Pallas kernel: fused triple 1x1-conv (+mean row) + spatial attention +
# BN affine + GELU epilogue.
# ----------------------------------------------------------------------------
def _elta_kernel(x_ref, w_ref, aff_ref, scal_ref, o_ref, *, cout, ep_dtype):
    # x_ref:    (1, Cin, TILE)    one batch image, TILE spatial positions (lanes)
    # w_ref:    (3*Cout+1, Cin)   [W_tfa ; s1*W1_perm4 ; s2*W2_perm8 ; mean_c(W_tfa)]
    # aff_ref:  (Cout, 5) f32     per-channel affines [b_tfa, s3, c3, t1, t2]
    # scal_ref: (5,)  f32 SMEM    [w_avg, w_max, 0.5*sc_tfa, 0.5*sc_ddp, mean(b_tfa)]
    # o_ref:    (1, Cout, TILE)
    x = x_ref[0]                                               # (Cin, TILE)
    # Single fused matmul for the TFA conv, both DDP convs and the TFA
    # channel-mean row; f32 accumulation on the MXU.
    y = jnp.dot(w_ref[...], x, preferred_element_type=jnp.float32)
    y = y.astype(ep_dtype)          # bf16 epilogue on v6e/v7x when requested

    aff = aff_ref[...].astype(ep_dtype)
    b_tfa = aff[:, 0:1]             # TFA conv bias
    s3 = aff[:, 1:2]                # TFA BN scale
    c3 = aff[:, 2:3]                # TFA BN offset
    t1 = aff[:, 3:4]                # DDP path1 folded affine offset
    t2 = aff[:, 4:5]                # DDP path2 folded affine offset

    w_avg = scal_ref[0].astype(ep_dtype)     # spatial-attention weights
    w_max = scal_ref[1].astype(ep_dtype)
    h_tfa = scal_ref[2].astype(ep_dtype)     # 0.5 * clamp(scaling_tfa, 0, 1)
    h_ddp = scal_ref[3].astype(ep_dtype)     # 0.5 * clamp(scaling_ddp, 0, 1)
    b_avg = scal_ref[4].astype(ep_dtype)     # mean(b_tfa)

    one = jnp.asarray(1.0, ep_dtype)
    inv_sqrt2 = jnp.asarray(0.7071067811865476, ep_dtype)

    def gelu2(v):
        # 2*GELU(v) = v*(1+erf(v/sqrt2)); the 1/2 is folded into h_tfa/h_ddp.
        return v * (one + lax.erf(v * inv_sqrt2))

    # ---- DDP paths first (short live ranges for their intermediates) ----
    out = h_ddp * (gelu2(y[cout:2 * cout] + t1)
                   + gelu2(y[2 * cout:3 * cout] + t2))

    # ---- TFA path: conv -> spatial attention -> residual -> BN -> GELU ----
    conv_out = y[:cout] + b_tfa                                # (Cout, TILE)
    avg = y[3 * cout:3 * cout + 1] + b_avg                     # channel mean (MXU)
    mx = jnp.max(conv_out, axis=0, keepdims=True)              # (1, TILE)
    attn = one / (one + jnp.exp(-(w_avg * avg + w_max * mx)))  # sigmoid
    z = conv_out * (one + attn)                                # attended + residual
    out = out + h_tfa * gelu2(s3 * z + c3)

    o_ref[0] = out.astype(o_ref.dtype)


def _elta_pallas(x3d, w_big, aff, scal, *, tile_n, ep_dtype, cost):
    B, cin, hw_pad = x3d.shape
    rows = w_big.shape[0]
    cout = aff.shape[0]
    assert hw_pad % tile_n == 0

    grid = (B, hw_pad // tile_n)
    kernel = functools.partial(_elta_kernel, cout=cout, ep_dtype=ep_dtype)
    return pl.pallas_call(
        kernel,
        out_shape=jax.ShapeDtypeStruct((B, cout, hw_pad), x3d.dtype),
        grid_spec=pltpu.PrefetchScalarGridSpec(
            num_scalar_prefetch=0,
            grid=grid,
            in_specs=[
                pl.BlockSpec((1, cin, tile_n), lambda b, j: (b, 0, j)),   # x tile
                pl.BlockSpec((rows, cin), lambda b, j: (0, 0)),           # fused W
                pl.BlockSpec((cout, 5), lambda b, j: (0, 0)),             # affines
                pl.BlockSpec(memory_space=pltpu.MemorySpace.SMEM),        # scalars
            ],
            out_specs=pl.BlockSpec((1, cout, tile_n), lambda b, j: (b, 0, j)),
        ),
        compiler_params=pltpu.CompilerParams(
            dimension_semantics=("parallel", "parallel"),
            vmem_limit_bytes=32 * 1024 * 1024,
        ),
        cost_estimate=cost,
    )(x3d, w_big, aff, scal)


# ----------------------------------------------------------------------------
# Parameter construction / folding glue
# ----------------------------------------------------------------------------
def _depth_perm_indices(c, groups):
    # x.view(B, g, C//g, H, W).transpose(1, 2).view(B, C, H, W)
    # => permuted channel k reads original channel perm[k]
    k = jnp.arange(c)
    return (k % groups) * (c // groups) + (k // groups)


def make_elta_params(key, in_channels, out_channels, dtype=jnp.float32):
    """Deterministic synthetic parameters for ELTA (eval mode)."""
    keys = jax.random.split(key, 10)
    bound = 1.0 / float(in_channels) ** 0.5

    def u(k, shape, b=bound):
        return jax.random.uniform(k, shape, dtype, -b, b)

    p = dict(
        # DDP path1 / path2 1x1 convs
        w1=u(keys[0], (out_channels, in_channels)),
        b1=u(keys[1], (out_channels,)),
        w2=u(keys[2], (out_channels, in_channels)),
        b2=u(keys[3], (out_channels,)),
        # TFA 1x1 conv (bias) + spatial-attention 1x1 conv (2->1, no bias)
        w_tfa=u(keys[4], (out_channels, in_channels)),
        b_tfa=u(keys[5], (out_channels,)),
        w_sa=jax.random.uniform(keys[6], (2,), dtype,
                                -1.0 / 2.0 ** 0.5, 1.0 / 2.0 ** 0.5),
        # ELTA learned scaling parameters (module init values)
        scaling_tfa=jnp.asarray(1.0, dtype),
        scaling_ddp=jnp.asarray(0.4, dtype),
    )
    # Non-trivial eval-mode BatchNorm stats/affine so the folding is exercised.
    for i, k in zip((1, 2, 3), (keys[7], keys[8], keys[9])):
        kg, kb, km, kv = jax.random.split(k, 4)
        p[f"gamma{i}"] = jax.random.uniform(kg, (out_channels,), dtype, 0.5, 1.5)
        p[f"beta{i}"] = 0.1 * jax.random.normal(kb, (out_channels,), dtype)
        p[f"mean{i}"] = 0.1 * jax.random.normal(km, (out_channels,), dtype)
        p[f"var{i}"] = jax.random.uniform(kv, (out_channels,), dtype, 0.5, 1.5)
    return p


@functools.partial(jax.jit, static_argnames=("tile_n", "eps", "epilogue_dtype"))
def elta_forward(x_nchw, params, *, tile_n=1024, eps=1e-5, epilogue_dtype=None):
    """x_nchw: [B, Cin, H, W] -> [B, Cout, H, W] (ELTA eval-mode forward)."""
    B, C, H, W = x_nchw.shape
    cout = params["w1"].shape[0]

    # Fold the DDP channel shuffles into the conv weights (column permutation):
    #   conv(x[:, perm]) == (W[:, argsort(perm)]) @ x
    inv4 = jnp.argsort(_depth_perm_indices(C, 4))
    inv8 = jnp.argsort(_depth_perm_indices(C, 8))

    # Fold eval-mode BN of the DDP paths: scale -> weights, offset -> t.
    s1 = params["gamma1"] / jnp.sqrt(params["var1"] + eps)
    t1 = s1 * (params["b1"] - params["mean1"]) + params["beta1"]
    w1_eff = jnp.take(params["w1"], inv4, axis=1) * s1[:, None]
    s2 = params["gamma2"] / jnp.sqrt(params["var2"] + eps)
    t2 = s2 * (params["b2"] - params["mean2"]) + params["beta2"]
    w2_eff = jnp.take(params["w2"], inv8, axis=1) * s2[:, None]

    # TFA BN affine (scale not folded into w_tfa: attention stats need raw conv).
    s3 = params["gamma3"] / jnp.sqrt(params["var3"] + eps)
    c3 = params["beta3"] - s3 * params["mean3"]

    sc_tfa = jnp.clip(params["scaling_tfa"], 0.0, 1.0).astype(jnp.float32)
    sc_ddp = jnp.clip(params["scaling_ddp"], 0.0, 1.0).astype(jnp.float32)

    # Stacked weight for the single fused matmul.  The extra last row is the
    # channel-mean of W_tfa: the TFA "avg" statistic then comes straight out of
    # the MXU instead of an in-kernel cross-sublane reduction.
    w_mean = jnp.mean(params["w_tfa"], axis=0, keepdims=True)
    w_big = jnp.concatenate([params["w_tfa"], w1_eff, w2_eff, w_mean],
                            axis=0).astype(x_nchw.dtype)        # (3*Cout+1, Cin)
    rows = w_big.shape[0]

    # Per-channel affines (VMEM) and true scalars (SMEM).  0.5 GELU prefactor
    # is folded into the clamped path scales.
    aff = jnp.stack([params["b_tfa"], s3, c3, t1, t2],
                    axis=1).astype(jnp.float32)                  # (Cout, 5)
    scal = jnp.stack(
        [params["w_sa"][0].astype(jnp.float32),
         params["w_sa"][1].astype(jnp.float32),
         0.5 * sc_tfa, 0.5 * sc_ddp,
         jnp.mean(params["b_tfa"]).astype(jnp.float32)])         # (5,)

    # --- tiling: pad H*W only to a multiple of 128 and choose the spatial tile
    #     among divisors of that (no tile-sized padding waste).  The tile is
    #     capped by a conservative VMEM budget so it fits v7x's smaller VMEM
    #     as well as v5e/v6e. ---
    hw = H * W
    hw128 = _round_up(hw, 128)
    dsize = jnp.dtype(x_nchw.dtype).itemsize
    # per-spatial-column footprint: double-buffered x/out tiles + f32 matmul
    # result + a few epilogue temporaries.
    bytes_per_col = 2 * (C + cout) * dsize + (rows + 2 * cout + 8) * 4
    budget = 16 * 1024 * 1024
    max_cols = max(128, (budget // bytes_per_col) // 128 * 128)
    target = max(128, min(_round_up(int(tile_n), 128), max_cols, hw128))
    k = hw128 // 128
    best = 1
    for d in range(1, k + 1):
        if k % d == 0 and 128 * d <= target:
            best = d
    tile = 128 * best
    # Keep >= 2 grid steps so both v7x TensorCores get work when possible.
    if B * (hw128 // tile) < 2 and k >= 2:
        for d in range(best - 1, 0, -1):
            if k % d == 0:
                tile = 128 * d
                break

    x3d = x_nchw.reshape(B, C, hw)
    if hw128 != hw:
        x3d = jnp.pad(x3d, ((0, 0), (0, 0), (0, hw128 - hw)))

    if epilogue_dtype is None:
        # bf16 epilogue when activations are bf16 (wins on v6e/v7x).
        # TODO(synk): on v5e (no bf16 VPU/EUP) pass epilogue_dtype=jnp.float32.
        ep_dtype = jnp.bfloat16 if x_nchw.dtype == jnp.bfloat16 else jnp.float32
    else:
        ep_dtype = epilogue_dtype

    cost = pl.CostEstimate(
        flops=2 * B * hw128 * C * rows,
        transcendentals=4 * B * hw128 * cout,
        bytes_accessed=B * hw128 * (C + cout) * dsize + w_big.size * dsize,
    )

    out3d = _elta_pallas(x3d, w_big, aff, scal,
                         tile_n=tile, ep_dtype=ep_dtype, cost=cost)
    return out3d[:, :, :hw].reshape(B, cout, H, W)


# ----------------------------------------------------------------------------
# Pure-JAX reference (eval-mode ELTA semantics) for a correctness check
# ----------------------------------------------------------------------------
def _elta_reference(x, params, eps=1e-5):
    B, C, H, W = x.shape

    def depth_perm(xin, g):
        xr = xin.reshape(B, g, C // g, H, W)
        xr = jnp.transpose(xr, (0, 2, 1, 3, 4))
        return xr.reshape(B, C, H, W)

    def gelu(y):
        return 0.5 * y * (1.0 + lax.erf(y / jnp.sqrt(2.0)))

    def bn(y, gamma, beta, mean, var):
        return ((y - mean[None, :, None, None])
                / jnp.sqrt(var[None, :, None, None] + eps)
                * gamma[None, :, None, None] + beta[None, :, None, None])

    def conv1x1(xin, w, b=None):
        y = jnp.einsum("bchw,oc->bohw", xin, w)
        if b is not None:
            y = y + b[None, :, None, None]
        return y

    # DDP
    y1 = gelu(bn(conv1x1(depth_perm(x, 4), params["w1"], params["b1"]),
                 params["gamma1"], params["beta1"], params["mean1"], params["var1"]))
    y2 = gelu(bn(conv1x1(depth_perm(x, 8), params["w2"], params["b2"]),
                 params["gamma2"], params["beta2"], params["mean2"], params["var2"]))
    ddp = y1 + y2

    # TFA
    conv_out = conv1x1(x, params["w_tfa"], params["b_tfa"])
    avg = jnp.mean(conv_out, axis=1, keepdims=True)
    mx = jnp.max(conv_out, axis=1, keepdims=True)
    attn = 1.0 / (1.0 + jnp.exp(-(params["w_sa"][0] * avg + params["w_sa"][1] * mx)))
    z = conv_out * attn + conv_out
    tfa = gelu(bn(z, params["gamma3"], params["beta3"],
                  params["mean3"], params["var3"]))

    s_tfa = jnp.clip(params["scaling_tfa"], 0.0, 1.0)
    s_ddp = jnp.clip(params["scaling_ddp"], 0.0, 1.0)
    return s_tfa * tfa + s_ddp * ddp


if __name__ == "__main__":
    key = jax.random.PRNGKey(0)
    k_param, k_x = jax.random.split(key)

    B, Cin, H, W = 2, 8, 16, 16     # Cin must be divisible by both 4 and 8
    Cout = 16
    dropout_prob = 0.9              # identity in eval mode

    params = make_elta_params(k_param, Cin, Cout)
    x = jax.random.normal(k_x, (B, Cin, H, W), jnp.float32)

    out = jax.block_until_ready(elta_forward(x, params))

    ref = _elta_reference(x, params)
    assert out.shape == (B, Cout, H, W)
    assert jnp.allclose(out, ref, atol=1e-4, rtol=1e-4), "mismatch vs reference"

    print("KERNEL_OK")
</pallas_src>

<mosaic_0001>
module attributes {stable_mosaic.version = 11 : i64} {
  func.func @_elta_kernel(%arg0: i32, %arg1: i32, %arg2: memref<1x8x256xf32, #tpu.memory_space<vmem>>, %arg3: memref<49x8xf32, #tpu.memory_space<vmem>>, %arg4: memref<16x5xf32, #tpu.memory_space<vmem>>, %arg5: memref<5xf32, #tpu.memory_space<smem>>, %arg6: memref<1x16x256xf32, #tpu.memory_space<vmem>>) attributes {dimension_semantics = [#tpu.dimension_semantics<parallel>, #tpu.dimension_semantics<parallel>], iteration_bounds = array<i64: 2, 1>, scalar_prefetch = 0 : i64, scratch_operands = 0 : i64, tpu.core_type = #tpu.core_type<tc>, window_params = [{transform_indices = @transform_0, window_bounds = array<i64: 1, 8, 256>}, {pipeline_mode = #tpu.pipeline_mode<synchronous>, transform_indices = @transform_1, window_bounds = array<i64: 49, 8>}, {pipeline_mode = #tpu.pipeline_mode<synchronous>, transform_indices = @transform_2, window_bounds = array<i64: 16, 5>}, {transform_indices = @transform_3, window_bounds = array<i64: 5>}, {transform_indices = @transform_4, window_bounds = array<i64: 1, 16, 256>}]} {
    %c0 = arith.constant 0 : index
    %c0_0 = arith.constant 0 : index
    %c0_1 = arith.constant 0 : index
    %0 = vector.load %arg2[%c0, %c0_0, %c0_1] : memref<1x8x256xf32, #tpu.memory_space<vmem>>, vector<1x8x256xf32>
    %1 = vector.shape_cast %0 : vector<1x8x256xf32> to vector<8x256xf32>
    %c0_2 = arith.constant 0 : index
    %c0_3 = arith.constant 0 : index
    %2 = vector.load %arg3[%c0_2, %c0_3] : memref<49x8xf32, #tpu.memory_space<vmem>>, vector<49x8xf32>
    %cst = arith.constant dense<0.000000e+00> : vector<49x256xf32>
    %3 = tpu.matmul %2, %1, %cst {dimension_numbers = #tpu.dot_dimension_numbers<[1], [0], [0], [1], [0, 0, 1, 1], [], []>} : vector<49x8xf32>, vector<8x256xf32>, vector<49x256xf32> -> vector<49x256xf32>
    %c0_4 = arith.constant 0 : index
    %c0_5 = arith.constant 0 : index
    %4 = vector.load %arg4[%c0_4, %c0_5] : memref<16x5xf32, #tpu.memory_space<vmem>>, vector<16x5xf32>
    %5 = vector.extract_strided_slice %4 {offsets = [0, 0], sizes = [16, 1], strides = [1, 1]} : vector<16x5xf32> to vector<16x1xf32>
    %6 = vector.extract_strided_slice %4 {offsets = [0, 1], sizes = [16, 1], strides = [1, 1]} : vector<16x5xf32> to vector<16x1xf32>
    %7 = vector.extract_strided_slice %4 {offsets = [0, 2], sizes = [16, 1], strides = [1, 1]} : vector<16x5xf32> to vector<16x1xf32>
    %8 = vector.extract_strided_slice %4 {offsets = [0, 3], sizes = [16, 1], strides = [1, 1]} : vector<16x5xf32> to vector<16x1xf32>
    %9 = vector.extract_strided_slice %4 {offsets = [0, 4], sizes = [16, 1], strides = [1, 1]} : vector<16x5xf32> to vector<16x1xf32>
    %c0_6 = arith.constant 0 : index
    %10 = memref.load %arg5[%c0_6] : memref<5xf32, #tpu.memory_space<smem>>
    %c1 = arith.constant 1 : index
    %11 = memref.load %arg5[%c1] : memref<5xf32, #tpu.memory_space<smem>>
    %c2 = arith.constant 2 : index
    %12 = memref.load %arg5[%c2] : memref<5xf32, #tpu.memory_space<smem>>
    %c3 = arith.constant 3 : index
    %13 = memref.load %arg5[%c3] : memref<5xf32, #tpu.memory_space<smem>>
    %c4 = arith.constant 4 : index
    %14 = memref.load %arg5[%c4] : memref<5xf32, #tpu.memory_space<smem>>
    %15 = vector.extract_strided_slice %3 {offsets = [16, 0], sizes = [16, 256], strides = [1, 1]} : vector<49x256xf32> to vector<16x256xf32>
    %16 = vector.broadcast %8 : vector<16x1xf32> to vector<16x256xf32>
    %17 = arith.addf %15, %16 : vector<16x256xf32>
    %cst_7 = arith.constant 0.707106769 : f32
    %18 = vector.broadcast %cst_7 : f32 to vector<16x256xf32>
    %19 = arith.mulf %17, %18 : vector<16x256xf32>
    %20 = math.erf %19 : vector<16x256xf32>
    %cst_8 = arith.constant 1.000000e+00 : f32
    %21 = vector.broadcast %cst_8 : f32 to vector<16x256xf32>
    %22 = arith.addf %21, %20 : vector<16x256xf32>
    %23 = arith.mulf %17, %22 : vector<16x256xf32>
    %24 = vector.extract_strided_slice %3 {offsets = [32, 0], sizes = [16, 256], strides = [1, 1]} : vector<49x256xf32> to vector<16x256xf32>
    %25 = vector.broadcast %9 : vector<16x1xf32> to vector<16x256xf32>
    %26 = arith.addf %24, %25 : vector<16x256xf32>
    %cst_9 = arith.constant 0.707106769 : f32
    %27 = vector.broadcast %cst_9 : f32 to vector<16x256xf32>
    %28 = arith.mulf %26, %27 : vector<16x256xf32>
    %29 = math.erf %28 : vector<16x256xf32>
    %cst_10 = arith.constant 1.000000e+00 : f32
    %30 = vector.broadcast %cst_10 : f32 to vector<16x256xf32>
    %31 = arith.addf %30, %29 : vector<16x256xf32>
    %32 = arith.mulf %26, %31 : vector<16x256xf32>
    %33 = arith.addf %23, %32 : vector<16x256xf32>
    %34 = vector.broadcast %13 : f32 to vector<16x256xf32>
    %35 = arith.mulf %34, %33 : vector<16x256xf32>
    %36 = vector.extract_strided_slice %3 {offsets = [0, 0], sizes = [16, 256], strides = [1, 1]} : vector<49x256xf32> to vector<16x256xf32>
    %37 = vector.broadcast %5 : vector<16x1xf32> to vector<16x256xf32>
    %38 = arith.addf %36, %37 : vector<16x256xf32>
    %39 = vector.extract_strided_slice %3 {offsets = [48, 0], sizes = [1, 256], strides = [1, 1]} : vector<49x256xf32> to vector<1x256xf32>
    %40 = vector.broadcast %14 : f32 to vector<1x256xf32>
    %41 = arith.addf %39, %40 : vector<1x256xf32>
    %cst_11 = arith.constant dense<0xFF800000> : vector<256xf32>
    %42 = vector.multi_reduction <maximumf>, %38, %cst_11 [0] : vector<16x256xf32> to vector<256xf32>
    %43 = vector.shape_cast %42 : vector<256xf32> to vector<1x256xf32>
    %44 = vector.broadcast %10 : f32 to vector<1x256xf32>
    %45 = arith.mulf %44, %41 : vector<1x256xf32>
    %46 = vector.broadcast %11 : f32 to vector<1x256xf32>
    %47 = arith.mulf %46, %43 : vector<1x256xf32>
    %48 = arith.addf %45, %47 : vector<1x256xf32>
    %cst_12 = arith.constant 0.000000e+00 : f32
    %49 = vector.broadcast %cst_12 : f32 to vector<1x256xf32>
    %50 = arith.subf %49, %48 : vector<1x256xf32>
    %51 = math.exp %50 : vector<1x256xf32>
    %cst_13 = arith.constant 1.000000e+00 : f32
    %52 = vector.broadcast %cst_13 : f32 to vector<1x256xf32>
    %53 = arith.addf %52, %51 : vector<1x256xf32>
    %cst_14 = arith.constant 1.000000e+00 : f32
    %54 = vector.broadcast %cst_14 : f32 to vector<1x256xf32>
    %55 = arith.divf %54, %53 : vector<1x256xf32>
    %cst_15 = arith.constant 1.000000e+00 : f32
    %56 = vector.broadcast %cst_15 : f32 to vector<1x256xf32>
    %57 = arith.addf %56, %55 : vector<1x256xf32>
    %58 = vector.broadcast %57 : vector<1x256xf32> to vector<16x256xf32>
    %59 = arith.mulf %38, %58 : vector<16x256xf32>
    %60 = vector.broadcast %6 : vector<16x1xf32> to vector<16x256xf32>
    %61 = arith.mulf %60, %59 : vector<16x256xf32>
    %62 = vector.broadcast %7 : vector<16x1xf32> to vector<16x256xf32>
    %63 = arith.addf %61, %62 : vector<16x256xf32>
    %cst_16 = arith.constant 0.707106769 : f32
    %64 = vector.broadcast %cst_16 : f32 to vector<16x256xf32>
    %65 = arith.mulf %63, %64 : vector<16x256xf32>
    %66 = math.erf %65 : vector<16x256xf32>
    %cst_17 = arith.constant 1.000000e+00 : f32
    %67 = vector.broadcast %cst_17 : f32 to vector<16x256xf32>
    %68 = arith.addf %67, %66 : vector<16x256xf32>
    %69 = arith.mulf %63, %68 : vector<16x256xf32>
    %70 = vector.broadcast %12 : f32 to vector<16x256xf32>
    %71 = arith.mulf %70, %69 : vector<16x256xf32>
    %72 = arith.addf %35, %71 : vector<16x256xf32>
    %c0_18 = arith.constant 0 : index
    %c0_19 = arith.constant 0 : index
    %c0_20 = arith.constant 0 : index
    %73 = vector.load %arg6[%c0_18, %c0_19, %c0_20] : memref<1x16x256xf32, #tpu.memory_space<vmem>>, vector<1x16x256xf32>
    %74 = vector.shape_cast %73 : vector<1x16x256xf32> to vector<16x256xf32>
    %75 = vector.shape_cast %72 : vector<16x256xf32> to vector<1x16x256xf32>
    tpu.vector_store %arg6[%c0_18, %c0_19, %c0_20], %75 {strides = array<i32>} : memref<1x16x256xf32, #tpu.memory_space<vmem>>, vector<1x16x256xf32>,
    return
  }
  func.func @transform_0(%arg0: i32, %arg1: i32) -> (i32, i32, i32) {
    %c0_i32 = arith.constant 0 : i32
    %c0_i32_0 = arith.constant 0 : i32
    return %arg0, %c0_i32, %arg1 : i32, i32, i32
  }
  func.func @transform_1(%arg0: i32, %arg1: i32) -> (i32, i32) {
    %c0_i32 = arith.constant 0 : i32
    %c0_i32_0 = arith.constant 0 : i32
    %c0_i32_1 = arith.constant 0 : i32
    return %c0_i32, %c0_i32_0 : i32, i32
  }
  func.func @transform_2(%arg0: i32, %arg1: i32) -> (i32, i32) {
    %c0_i32 = arith.constant 0 : i32
    %c0_i32_0 = arith.constant 0 : i32
    %c0_i32_1 = arith.constant 0 : i32
    return %c0_i32, %c0_i32_0 : i32, i32
  }
  func.func @transform_3(%arg0: i32, %arg1: i32) -> i32 {
    %c0_i32 = arith.constant 0 : i32
    %c0_i32_0 = arith.constant 0 : i32
    return %c0_i32 : i32
  }
  func.func @transform_4(%arg0: i32, %arg1: i32) -> (i32, i32, i32) {
    %c0_i32 = arith.constant 0 : i32
    %c0_i32_0 = arith.constant 0 : i32
    return %arg0, %c0_i32, %arg1 : i32, i32, i32
  }
}

</mosaic_0001>

<bundles_post_ra>
// kernel: elta_forward.1
= control target key start
LH: loop header
LB: loop body
LE: loop exit
PB: predicated region body
PF: predicated region fallthrough
CT: control target
= control target key end

     0   :  { %9 = vsyncpa [#allocation3], 0  ;;  %s862_s15 = smov 0   ;;  %s864_s16 = smov 0   ;;  %s1012_s0 = inlined_call_operand.vmem [shape: f32[2,8,256], index: 0, kind: input, shape index: {}]   ;;  %s1013_s1 = inlined_call_operand.vmem [shape: f32[49,8], index: 1, kind: input, shape index: {}]   ;;  %s1014_s2 = inlined_call_operand.vmem [shape: f32[16,5], index: 2, kind: input, shape index: {}]   ;;  %s1015_s3 = inlined_call_operand.vmem [shape: f32[5], index: 3, kind: input, shape index: {}]   ;;  %s1016_s4 = inlined_call_operand.vmem [shape: f32[2,16,256], index: 4, kind: output, shape index: {}]  }
   0x1   :  { %s866_s17 = smov 0  }
   0x2 LB: > { %s678_s18 = sadd.s32 4294967295, %s828_s17   ;;  %s27_s19 = sadd.s32 1, %s824_s16  ;;  %s828_s17 = sphi %s866_s17, %s15_s17   ;;  %s824_s16 = sphi %s864_s16, %s1020_s16   ;;  %s820_s15 = sphi %s862_s15, %s1019_s15  }
   0x3   : > { %p29_p0 = scmp.ge.s32.totalorder %s27_s19, 2  ;;  %p680_p1 = scmp.ge.s32.totalorder %s828_s17, 1 }
   0x4   : > { %p151_p2 = scmp.lt.s32.totalorder %s828_s17, 3  ;;  %p887_p4 = scmp.eq.s32.totalorder %s678_s18, 0 }
   0x5   : > { %s1022_s19 = smov (%p29_p0, %s27_s19), 0  ;;  %s170_s24 = sshll.u32 %s1015_s3, 4  ;;  %s171_s24 = int_to_ptr.vmem [resolvable:$true] %s170_s24 }
   0x6   : > { %p883_p3 = pnand %p680_p1, %p151_p2  ;;  %s787_s25 = scalar_lea.vmem %s171_s24, 16 }
   0x7   : > { %p788_p7 = scmp.ne.s32.totalorder %s171_s24, %s787_s25  ;;  %p795_p11 = scmp.lt.s32.totalorder %s171_s24, %s171_s24 }
   0x8   : > { %p710_p5 = pneg %p883_p3  ;;  %p796_p12 = scmp.lt.s32.totalorder %s787_s25, %s787_s25 }
   0xa   : > { %p711_p6 = pnand %p887_p4, %p710_p5  ;;  %p797_p13 = por %p796_p12, %p795_p11 }
   0xc   : > { %p789_p8 = pneg %p711_p6 }
   0xe   : > { %p790_p9 = pnand %p789_p8, %p788_p7 }
  0x10   : > { %p791_p10 = pneg %p790_p9 }
  0x12   : > { %p798_p0 = pnand %p797_p13, %p791_p10 }
  0x14   : > { %801 = shalt.err (!%p798_p0)
}
  0x15   : > { %s830_s26 = smov [#allocation2]   ;;  %196 = sbr.rel (%p883_p3) target bundleno = 338 (0x152), region = 36 }
  0x16   : > { %713 = dma.vmem_to_smem (!%p711_p6), %s171_s24, 16, %s830_s26, [#allocation3]  }
  0x1c   : > { %815 = dma.done.wait (%p887_p4), [#allocation3], 16  }
  0x1d   : > { %817 = vsyncadd (%p887_p4), [#allocation3], 4294967280 }
  0x1e   : > { %202 = sfence }
  0x1f   : > { %p232_p1 = scmp.lt.s32.totalorder %s820_s15, 1  ;;  %v831_v0 = vmov 0.0   ;;  %v832_v1 = vmov 0   ;;  %v389_v2 = vld [vmem:[%s1014_s2] sm:$0xff]  ;;  %v833_v3 = vmov 3   ;;  %vm260_vm0 = vcmask 64512  }
  0x20   : > { %346 = vmatprep.mubr.f32.mxu0 %v831_v0  ;;  %370 = vmatprep.mubr.f32.mxu1 %v831_v0  ;;  %v253_v4 = vld [vmem:[%s1013_s1] sm:$0xff]  ;;  %v390_v8 = vld [vmem:[%s1014_s2 + $0x8] sm:$0xff]  ;;  %v255_v11 = vld [vmem:[%s1013_s1 + $0x10] sm:$0xff]  ;;  %v834_v13 = vmov 4   ;;  %v835_v15 = vmov 1   ;;  %v836_v16 = vmov 2  }
  0x21   : > { %s1024_s15 = smov (!%p232_p1, %s820_s15), 1  ;;  %747 = vset.pattern.permute.xlu0 %v832_v1  ;;  %748 = vset.pattern.permute.xlu1 %v833_v3  ;;  %v257_v7 = vld [vmem:[%s1013_s1 + $0x20] sm:$0xff]  ;;  %v254_v9 = vld [vmem:[%s1013_s1 + $0x8] sm:$0xff]  ;;  %v259_v12 = vld [vmem:[%s1013_s1 + $0x30] sm:$0x1]  ;;  %s950_s27 = sld [smem:[#allocation2 + $0x4]] }
  0x22   : > { %464 = vperm.xlu0 %747, %v389_v2   ;;  %398 = vperm.xlu1 %748, %v389_v2   ;;  %s702_s29 = sshll.u32 %s1024_s15, 4  ;;  %v258_v10 = vld [vmem:[%s1013_s1 + $0x28] sm:$0xff]  ;;  %v256_v14 = vld [vmem:[%s1013_s1 + $0x18] sm:$0xff]  ;;  %s972_s28 = sld [smem:[#allocation2]] }
  0x23   : > { %s239_s6 = scalar_lea.vmem %s1012_s0, %s702_s29  ;;  %s974_s29 = sld [smem:[#allocation2 + $0x1]] }
  0x24   : > { %v252_v5 = vld [vmem:[%s239_s6 + $0x8] sm:$0xff]  ;;  %v251_v6 = vld [vmem:[%s239_s6] sm:$0xff]  ;;  %s698_s30 = sld [smem:[#allocation2 + $0x3]]  ;;  %s697_s5 = sld [smem:[#allocation2 + $0x2]] }
  0x25   : > { %282 = vmatprep.subr.mxu0 %v252_v5  ;;  %704 = vmatprep.subr.mxu1 %v252_v5  ;;  %s703_s6 = sshll.u32 %s1024_s15, 5 }
  0x26   : > { %283 = vmatpush1.msra.mxu0 %v251_v6  ;;  %705 = vmatpush1.msra.mxu1 %v251_v6  ;;  %s249_s9 = scalar_lea.vmem %s1016_s4, %s703_s6 }
  0x27   : > { %689 = vmatmul.mubr.msk.f32.vlgmr.msra.gmra.mrb[0].mxu0 %vm260_vm0, %v253_v4  ;;  %693 = vmatmul.mubr.msk.f32.vlgmr.msra.gmra.mrb[0].mxu1 %vm260_vm0, %v257_v7  ;;  %v475_v58 = vstv %s950_s27 }
  0x28   : > { %352 = vmatprep.mubr.f32.mxu0 %v831_v0  ;;  %376 = vmatprep.mubr.f32.mxu1 %v831_v0  ;;  %v492_v5 = vstv %s972_s28 }
  0x29   : > { %468 = vperm.xlu0 %747, %v390_v8   ;;  %403 = vperm.xlu1 %748, %v390_v8  }
  0x2b   : > { %690 = vmatmul.mubr.msk.f32.gmra.mrb[2].mxu0 %vm260_vm0, %v254_v9  ;;  %694 = vmatmul.mubr.msk.f32.gmra.mrb[2].mxu1 %vm260_vm0, %v258_v10  ;;  %v495_v9 = vstv %s974_s29 }
  0x2c   : > { %358 = vmatprep.mubr.f32.mxu0 %v831_v0  ;;  %382 = vmatprep.mubr.f32.mxu1 %v831_v0 }
  0x2d   : > { %749 = vset.pattern.permute.xlu0 %v834_v13  ;;  %750 = vset.pattern.permute.xlu1 %v834_v13 }
  0x2e   : > { %427 = vperm.xlu0 %749, %v389_v2   ;;  %431 = vperm.xlu1 %750, %v390_v8  }
  0x2f   : > { %691 = vmatmul.mubr.msk.f32.gmra.mrb[4].mxu0 %vm260_vm0, %v255_v11  ;;  %695 = vmatmul.mubr.msk.f32.gmra.mrb[4].mxu1 %vm260_vm0, %v259_v12 }
  0x30   : > { %364 = vmatprep.mubr.f32.mxu0 %v831_v0 }
  0x32   : > { %751 = vset.pattern.permute.xlu1 %v835_v15  ;;  %752 = vset.pattern.permute.xlu0 %v835_v15 }
  0x33   : > { %692 = vmatmul.mubr.msk.f32.gmra.mrb[6].mxu0 %vm260_vm0, %v256_v14  ;;  %527 = vperm.xlu1 %751, %v389_v2  }
  0x34   : > { %531 = vperm.xlu0 %752, %v390_v8  }
  0x37   : > { %753 = vset.pattern.permute.xlu1 %v836_v16 }
  0x38   : > { %539 = vperm.xlu1 %753, %v389_v2   ;;  %754 = vset.pattern.permute.xlu0 %v836_v16 }
  0x3c   : > { %543 = vperm.xlu1 %753, %v390_v8  }
  0xa1   : > { %v465_v17 = vpop.permute.xlu0 %464  ;;  %v399_v18 = vpop.permute.xlu1 %398 }
  0xa8   : > { %v469_v19 = vpop.permute.xlu0 %468  ;;  %v404_v20 = vpop.permute.xlu1 %403 }
  0xad   : > { %v428_v21 = vpop.permute.xlu0 %427  ;;  %v432_v28 = vpop.permute.xlu1 %431 }
  0xfa   : > { %v348_v22 = vpop.f32.mrb[0].mxu0  ;;  %v372_v23 = vpop.f32.mrb[0].mxu1 }
  0xfb   : > { %v946_v24 = vadd.f32 %v428_v21, %v372_v23  ;;  %v350_v25 = vpop.f32.mrb[1].mxu0  ;;  %v374_v26 = vpop.f32.mrb[1].mxu1  ;;  %v952_v31 = vadd.f32 %v465_v17, %v348_v22 }
  0xfc   : > { %v948_v27 = vadd.f32 %v428_v21, %v374_v26  ;;  %v959_v37 = vadd.f32 %v465_v17, %v350_v25 }
  0xfd   : > { %v438_v32 = vmul.f32 0.70710677, %v946_v24 }
  0xfe   : > { %v354_v29 = vpop.f32.mrb[2].mxu0  ;;  %v378_v30 = vpop.f32.mrb[2].mxu1  ;;  %v439_v38 = vmul.f32 0.70710677, %v948_v27 }
  0xff   : > { %v955_v33 = vadd.f32 %v469_v19, %v354_v29  ;;  %v957_v34 = vadd.f32 %v432_v28, %v378_v30  ;;  %v356_v35 = vpop.f32.mrb[3].mxu0  ;;  %v380_v36 = vpop.f32.mrb[3].mxu1  ;;  %755 = verf.f32 %v438_v32 }
 0x100   : > { %v962_v39 = vadd.f32 %v469_v19, %v356_v35  ;;  %v964_v40 = vadd.f32 %v432_v28, %v380_v36  ;;  %757 = verf.f32 %v439_v38 }
 0x101   : > { %v478_v41 = vmax.f32 %v952_v31, %v955_v33  ;;  %v440_v42 = vmul.f32 0.70710677, %v957_v34 }
 0x102   : > { %v485_v43 = vmax.f32 %v959_v37, %v962_v39  ;;  %v441_v44 = vmul.f32 0.70710677, %v964_v40  ;;  %v360_v45 = vpop.f32.mrb[4].mxu0  ;;  %v384_v46 = vpop.f32.mrb[4].mxu1 }
 0x103   : > { %v479_v47 = vrot.slane %v478_v41, 4  ;;  %v406_v48 = vadd.f32 %v399_v18, %v360_v45  ;;  %v362_v49 = vpop.f32.mrb[5].mxu0  ;;  %v386_v50 = vpop.f32.mrb[5].mxu1  ;;  %759 = verf.f32 %v440_v42  ;;  %v476_v2 = vadd.f32 %v475_v58, %v384_v46 }
 0x104   : > { %v486_v51 = vrot.slane %v485_v43, 4  ;;  %v407_v52 = vadd.f32 %v399_v18, %v362_v49  ;;  %761 = verf.f32 %v441_v44  ;;  %v477_v6 = vadd.f32 %v475_v58, %v386_v50 }
 0x105   : > { %v480_v53 = vmax.f32 %v478_v41, %v479_v47  ;;  %v410_v54 = vmul.f32 0.70710677, %v406_v48  ;;  %v493_v12 = vmul.f32 %v492_v5, %v476_v2 }
 0x106   : > { %v487_v55 = vmax.f32 %v485_v43, %v486_v51  ;;  %v411_v56 = vmul.f32 0.70710677, %v407_v52  ;;  %v366_v57 = vpop.f32.mrb[6].mxu0  ;;  %v494_v15 = vmul.f32 %v492_v5, %v477_v6  ;;  %v532_v5 = vpop.permute.xlu0 %531 }
 0x107   : > { %v481_v59 = vrot.slane %v480_v53, 2  ;;  %763 = verf.f32 %v410_v54  ;;  %v408_v60 = vadd.f32 %v404_v20, %v366_v57  ;;  %v368_v61 = vpop.f32.mrb[7].mxu0 }
 0x108   : > { %v488_v62 = vrot.slane %v487_v55, 2  ;;  %765 = verf.f32 %v411_v56  ;;  %v409_v63 = vadd.f32 %v404_v20, %v368_v61  ;;  %v514_v61 = vlaneseq }
 0x109   : > { %v482_v0 = vmax.f32 %v480_v53, %v481_v59  ;;  %v412_v1 = vmul.f32 0.70710677, %v408_v60  ;;  %v756_v10 = vpop.eup %755 }
 0x10a   : > { %v489_v3 = vmax.f32 %v487_v55, %v488_v62  ;;  %v413_v4 = vmul.f32 0.70710677, %v409_v63  ;;  %v758_v13 = vpop.eup %757  ;;  %v446_v19 = vadd.f32 1.0, %v756_v10  ;;  %v515_v62 = vshrl.u32 %v514_v61, 7 }
 0x10b   : > { %v483_v7 = vrot.slane %v482_v0, 1  ;;  %767 = verf.f32 %v412_v1  ;;  %v447_v22 = vadd.f32 1.0, %v758_v13 }
 0x10c   : > { %v490_v8 = vrot.slane %v489_v3, 1  ;;  %769 = verf.f32 %v413_v4  ;;  %v450_v32 = vmul.f32 %v446_v19, %v946_v24  ;;  %v516_v1 = vsub.s32 0, %v515_v62 }
 0x10d   : > { %v484_v11 = vmax.f32 %v482_v0, %v483_v7  ;;  %v760_v16 = vpop.eup %759  ;;  %v451_v42 = vmul.f32 %v447_v22, %v948_v27  ;;  %v528_v0 = vpop.permute.xlu1 %527 }
 0x10e   : > { %v491_v14 = vmax.f32 %v489_v3, %v490_v8  ;;  %v762_v18 = vpop.eup %761  ;;  %v448_v35 = vadd.f32 1.0, %v760_v16 }
 0x10f   : > { %v496_v17 = vmul.f32 %v495_v9, %v484_v11  ;;  %v449_v43 = vadd.f32 1.0, %v762_v18 }
 0x110   : > { %v497_v20 = vmul.f32 %v495_v9, %v491_v14  ;;  %v452_v24 = vmul.f32 %v448_v35, %v957_v34 }
 0x111   : > { %v764_v21 = vpop.eup %763  ;;  %v498_v23 = vadd.f32 %v496_v17, %v493_v12 }
 0x112   : > { %v766_v25 = vpop.eup %765  ;;  %v418_v26 = vadd.f32 1.0, %v764_v21  ;;  %v499_v28 = vadd.f32 %v497_v20, %v494_v15 }
 0x113   : > { %v419_v29 = vadd.f32 1.0, %v766_v25  ;;  %v500_v30 = vsub.f32 0.0, %v498_v23  ;;  %v458_v23 = vstv %s698_s30  ;;  %v566_v25 = vstv %s697_s5 }
 0x114   : > { %v422_v36 = vmul.f32 %v418_v26, %v406_v48  ;;  %v501_v38 = vsub.f32 0.0, %v499_v28  ;;  %v453_v48 = vmul.f32 %v449_v43, %v964_v40  ;;  %v540_v40 = vpop.permute.xlu1 %539 }
 0x115   : > { %v768_v41 = vpop.eup %767  ;;  %v423_v44 = vmul.f32 %v419_v29, %v407_v52  ;;  %v502_v45 = vmul.f32 1.442695, %v500_v30 }
 0x116   : > { %v770_v46 = vpop.eup %769  ;;  %v981_v47 = vadd.f32 %v450_v32, %v422_v36  ;;  %v420_v49 = vadd.f32 1.0, %v768_v41  ;;  %v504_v50 = vmul.f32 1.442695, %v501_v38 }
 0x117   : > { %v983_v51 = vadd.f32 %v451_v42, %v423_v44  ;;  %v421_v53 = vadd.f32 1.0, %v770_v46  ;;  %771 = vpow2.f32 %v502_v45 }
 0x118   : > { %v424_v54 = vmul.f32 %v420_v49, %v408_v60  ;;  %773 = vpow2.f32 %v504_v50  ;;  %v544_v13 = vpop.permute.xlu1 %543  ;;  %v459_v36 = vmul.f32 %v458_v23, %v981_v47 }
 0x119   : > { %v425_v55 = vmul.f32 %v421_v53, %v409_v63  ;;  %v460_v42 = vmul.f32 %v458_v23, %v983_v51 }
 0x11a   : > { %v987_v27 = vadd.f32 %v452_v24, %v424_v54 }
 0x11b   : > { %v989_v52 = vadd.f32 %v453_v48, %v425_v55 }
 0x11c   : > { %v461_v45 = vmul.f32 %v458_v23, %v987_v27 }
 0x11d   : > { %v462_v50 = vmul.f32 %v458_v23, %v989_v52 }
 0x121   : > { %v772_v56 = vpop.eup %771 }
 0x122   : > { %v774_v57 = vpop.eup %773  ;;  %v506_v58 = vadd.f32 1.0, %v772_v56 }
 0x123   : > { %v507_v59 = vadd.f32 1.0, %v774_v57 }
 0x124   : > { %775 = vrcp.f32 %v506_v58 }
 0x125   : > { %777 = vrcp.f32 %v507_v59 }
 0x12e   : > { %v776_v34 = vpop.eup %775 }
 0x12f   : > { %v778_v60 = vpop.eup %777  ;;  %v512_v2 = vadd.f32 1.0, %v776_v34 }
 0x130   : > { %v513_v3 = vadd.f32 1.0, %v778_v60 }
 0x131   : > { %v517_v63 = vrot.slane %v512_v2, %v516_v1 }
 0x132   : > { %v521_v4 = vrot.slane %v513_v3, %v516_v1 }
 0x133   : > { %v522_v6 = vmul.f32 %v517_v63, %v952_v31  ;;  %v524_v7 = vmul.f32 %v517_v63, %v955_v33 }
 0x134   : > { %v523_v8 = vmul.f32 %v521_v4, %v959_v37  ;;  %v525_v9 = vmul.f32 %v521_v4, %v962_v39 }
 0x135   : > { %v534_v10 = vmul.f32 %v528_v0, %v522_v6  ;;  %v536_v11 = vmul.f32 %v532_v5, %v524_v7 }
 0x136   : > { %v535_v12 = vmul.f32 %v528_v0, %v523_v8  ;;  %v537_v14 = vmul.f32 %v532_v5, %v525_v9 }
 0x137   : > { %v546_v15 = vadd.f32 %v540_v40, %v534_v10  ;;  %v548_v16 = vadd.f32 %v544_v13, %v536_v11 }
 0x138   : > { %v547_v17 = vadd.f32 %v540_v40, %v535_v12  ;;  %v549_v18 = vadd.f32 %v544_v13, %v537_v14 }
 0x139   : > { %v550_v19 = vmul.f32 0.70710677, %v546_v15  ;;  %v552_v20 = vmul.f32 0.70710677, %v548_v16 }
 0x13a   : > { %v551_v21 = vmul.f32 0.70710677, %v547_v17  ;;  %v553_v31 = vmul.f32 0.70710677, %v549_v18 }
 0x13b   : > { %779 = verf.f32 %v550_v19 }
 0x13c   : > { %781 = verf.f32 %v551_v21 }
 0x13d   : > { %783 = verf.f32 %v552_v20 }
 0x13e   : > { %785 = verf.f32 %v553_v31 }
 0x145   : > { %v780_v33 = vpop.eup %779 }
 0x146   : > { %v782_v37 = vpop.eup %781  ;;  %v558_v39 = vadd.f32 1.0, %v780_v33 }
 0x147   : > { %v784_v22 = vpop.eup %783  ;;  %v559_v26 = vadd.f32 1.0, %v782_v37 }
 0x148   : > { %v786_v28 = vpop.eup %785  ;;  %v562_v29 = vmul.f32 %v558_v39, %v546_v15  ;;  %v560_v30 = vadd.f32 1.0, %v784_v22 }
 0x149   : > { %v563_v32 = vmul.f32 %v559_v26, %v547_v17  ;;  %v561_v35 = vadd.f32 1.0, %v786_v28 }
 0x14a   : > { %v567_v38 = vmul.f32 %v566_v25, %v562_v29  ;;  %v564_v41 = vmul.f32 %v560_v30, %v548_v16 }
 0x14b   : > { %v568_v43 = vmul.f32 %v566_v25, %v563_v32  ;;  %v565_v44 = vmul.f32 %v561_v35, %v549_v18 }
 0x14c   : > { %v571_v46 = vadd.f32 %v567_v38, %v459_v36  ;;  %v569_v49 = vmul.f32 %v566_v25, %v564_v41 }
 0x14d   : > { %v572_v53 = vadd.f32 %v568_v43, %v460_v42  ;;  %v570_v24 = vmul.f32 %v566_v25, %v565_v44 }
 0x14e   : > { %575 = vst [vmem:[%s249_s9] sm:$0xff] %v571_v46  ;;  %v573_v47 = vadd.f32 %v569_v49, %v461_v45 }
 0x14f   : > { %576 = vst [vmem:[%s249_s9 + $0x8] sm:$0xff] %v572_v53  ;;  %v574_v54 = vadd.f32 %v570_v24, %v462_v50 }
 0x150   : > { %577 = vst [vmem:[%s249_s9 + $0x10] sm:$0xff] %v573_v47 }
 0x151   : > { %578 = vst [vmem:[%s249_s9 + $0x18] sm:$0xff] %v574_v54 }
 0x152 PF: > { %s15_s17 = sadd.s32 1, %s828_s17   ;;  %s1019_s15 = smov %s824_s16 }
 0x153   : > { %p12_p2 = scmp.ge.s32.totalorder %s15_s17, 4   ;;  %s1020_s16 = smov %s1022_s19 }
 0x155   :  { %14 = sbr.rel (!%p12_p2) target bundleno = 2 (0x2), region = 71 }
 0x15c   :  { %609 = vsyncpa [#allocation3], 1 }
 0x15d   :  { %611 = vsyncpa [#allocation3 + $0x1], 1 }

</bundles_post_ra>
